<compile_context>
chip_gen: v5e
topology: v5e:2x2
jax: 0.10.0
libtpu: 0.0.40
codegen_flags: <defaults>
</compile_context>

<pallas_src>
import functools

import jax
import jax.numpy as jnp
from jax.experimental import pallas as pl
from jax.experimental.pallas import tpu as pltpu


def _dwconv_bn_pw_kernel(xf_ref, w_ref, out_ref, col_ref, *, K, Wp, M, R):
    """One grid step = Nb packed images (R = Nb*Cin sublane rows).

    xf_ref : (R, Lp)          zero-padded inputs, flat spatial (row stride Wp)
    w_ref  : (Nb*Cout, Kc)    block-diag fused dw*BN*pw weight; column K*K*R is the
                              fused bias, remaining columns are zero padding
    out_ref: (Nb*Cout, M)     flat padded-grid output (row stride Wp)
    col_ref: (Kc, M)          im2col scratch (contraction dim padded to sublane multiple)
    """
    KK = K * K
    Kc = col_ref.shape[0]

    # Constant tail of the im2col (ones row for the folded bias + zero padding rows).
    # Scratch persists across grid steps -> write it once.
    @pl.when(pl.program_id(0) == 0)
    def _init_tail():
        npad = Kc - (KK * R + 1)
        if npad > 0:
            col_ref[KK * R + 1:, :] = jnp.zeros((npad, M), col_ref.dtype)
        col_ref[KK * R:KK * R + 1, :] = jnp.ones((1, M), col_ref.dtype)

    # im2col: K*K static lane-offset reads of the flat padded images (pure lane shifts,
    # no 3-D retiling); each tap block lands at an aligned sublane offset t*R.
    x = xf_ref[...]                                        # (R, Lp), native dtype
    for kh in range(K):
        for kw in range(K):
            t = kh * K + kw
            d = kh * Wp + kw
            col_ref[t * R:(t + 1) * R, :] = x[:, d:d + M]

    # Single fused depthwise+BN+pointwise(+bias) matmul on the MXU, f32 accumulation,
    # lane-dense result / stores directly in NCHW flat coordinates.
    out = jnp.dot(w_ref[...], col_ref[...], preferred_element_type=jnp.float32)
    out_ref[...] = out.astype(out_ref.dtype)


def _pick_images_per_step(N, Cin, Cout, sublane):
    """Smallest divisor Nb of N that fills whole sublane groups for both the packed
    input (Nb*Cin) and output (Nb*Cout) blocks; falls back to one step over all images
    (block == full array, so the (8,128) BlockSpec rule is still satisfied)."""
    for nb in range(1, N + 1):
        if N % nb == 0 and (nb * Cin) % sublane == 0 and (nb * Cout) % sublane == 0:
            return nb
    return N


def depthwise_conv_forward(x_nchw, params, *, kernel_size, padding, stride,
                           bn_eps=1e-5):
    """Equivalent of DepthWiseConv.forward (BN in eval mode). NCHW in, NCHW out."""
    dw_w = params["dw_w"].astype(jnp.float32)      # (Cin, 1, K, K) torch depthwise layout
    dw_b = params["dw_b"].astype(jnp.float32)      # (Cin,)
    gamma = params["bn_gamma"].astype(jnp.float32)
    beta = params["bn_beta"].astype(jnp.float32)
    r_mean = params["bn_mean"].astype(jnp.float32)
    r_var = params["bn_var"].astype(jnp.float32)
    pw_w = params["pw_w"].astype(jnp.float32)      # (Cout, Cin, 1, 1)
    pw_b = params["pw_b"].astype(jnp.float32)      # (Cout,)

    N, Cin, H, W = x_nchw.shape
    Cout = pw_w.shape[0]
    K, P, S = kernel_size, padding, stride
    Ho = (H + 2 * P - K) // S + 1
    Wo = (W + 2 * P - K) // S + 1
    Hp, Wp = H + 2 * P, W + 2 * P

    # Kernel evaluates the stride-1 conv at every column of the first Hv padded rows;
    # the valid (possibly strided) (Ho, Wo) window is sliced out afterwards.
    Hv = (Ho - 1) * S + 1
    Wv = (Wo - 1) * S + 1
    M = Hv * Wp
    d_max = (K - 1) * Wp + (K - 1)

    # Single pad pass: spatial halo + enough extra zero rows at the bottom so every
    # static lane-offset read stays in bounds. Reshape to flat (N*Cin, Lp) is free.
    need = M + d_max
    extra_rows = 0 if need <= Hp * Wp else -(-(need - Hp * Wp) // Wp)
    xp = jnp.pad(x_nchw, ((0, 0), (0, 0), (P, P + extra_rows), (P, P)))
    Lp = (Hp + extra_rows) * Wp
    xf = xp.reshape(N * Cin, Lp)

    # Images per grid step (sublane packing).
    sublane = 8 if jnp.dtype(x_nchw.dtype).itemsize >= 4 else 16
    Nb = _pick_images_per_step(N, Cin, Cout, sublane)
    R = Nb * Cin
    KK = K * K

    # Trace-time folding: BN(eval) + depthwise bias into the depthwise taps, then
    # depthwise x pointwise into one block-diagonal (over the Nb packed images) fused
    # weight with the fused bias as an extra column; contraction dim padded to a
    # sublane multiple so the im2col scratch tail is explicit zeros.
    scale = gamma / jnp.sqrt(r_var + bn_eps)                       # (Cin,)
    shift = beta + (dw_b - r_mean) * scale                         # (Cin,)
    dww = dw_w[:, 0].reshape(Cin, KK) * scale[:, None]             # (Cin, K*K)
    pww = pw_w[:, :, 0, 0]                                         # (Cout, Cin)
    pwb = pww @ shift + pw_b                                       # (Cout,)
    wf = jnp.einsum("oc,ct->otc", pww, dww)                        # (Cout, K*K, Cin)
    wbd = jnp.einsum("nm,otc->notmc", jnp.eye(Nb, dtype=jnp.float32), wf)
    wbd = wbd.reshape(Nb * Cout, KK * R)                           # block-diag over images
    bias_col = jnp.tile(pwb, Nb)[:, None]                          # (Nb*Cout, 1)
    Kc = -(-(KK * R + 1) // sublane) * sublane
    wfull = jnp.concatenate(
        [wbd, bias_col, jnp.zeros((Nb * Cout, Kc - KK * R - 1), jnp.float32)],
        axis=1).astype(x_nchw.dtype)                               # (Nb*Cout, Kc)

    kernel = functools.partial(_dwconv_bn_pw_kernel, K=K, Wp=Wp, M=M, R=R)

    out_flat = pl.pallas_call(
        kernel,
        out_shape=jax.ShapeDtypeStruct((N * Cout, M), x_nchw.dtype),
        grid_spec=pltpu.PrefetchScalarGridSpec(
            num_scalar_prefetch=0,
            grid=(N // Nb,),
            in_specs=[
                pl.BlockSpec((R, Lp), lambda b: (b, 0)),
                pl.BlockSpec((Nb * Cout, Kc), lambda b: (0, 0)),
            ],
            out_specs=pl.BlockSpec((Nb * Cout, M), lambda b: (b, 0)),
            scratch_shapes=[pltpu.VMEM((Kc, M), x_nchw.dtype)],
        ),
        compiler_params=pltpu.CompilerParams(
            dimension_semantics=("parallel",)),
    )(xf, wfull)

    # Free reshape + cheap (strided) slice; output is already NCHW — no transpose.
    out = out_flat.reshape(N, Cout, Hv, Wp)[:, :, ::S, 0:Wv:S]
    return out


def _reference_forward(x_nchw, params, *, kernel_size, padding, stride,
                       bn_eps=1e-5):
    """Pure-JAX reference (lax.conv) for verification."""
    Cin = x_nchw.shape[1]
    y = jax.lax.conv_general_dilated(
        x_nchw, params["dw_w"],
        window_strides=(stride, stride),
        padding=[(padding, padding), (padding, padding)],
        feature_group_count=Cin,
        dimension_numbers=("NCHW", "OIHW", "NCHW"))
    y = y + params["dw_b"][None, :, None, None]
    scale = params["bn_gamma"] / jnp.sqrt(params["bn_var"] + bn_eps)
    y = (y - params["bn_mean"][None, :, None, None]) * scale[None, :, None, None]
    y = y + params["bn_beta"][None, :, None, None]
    y = jax.lax.conv_general_dilated(
        y, params["pw_w"],
        window_strides=(1, 1),
        padding=[(0, 0), (0, 0)],
        dimension_numbers=("NCHW", "OIHW", "NCHW"))
    return y + params["pw_b"][None, :, None, None]


if __name__ == "__main__":
    # Module config: DepthWiseConv(dim_in=4, dim_out=8, kernel_size=3, padding=1, stride=1)
    N, Cin, H, W = 2, 4, 16, 16
    Cout, K, P, S = 8, 3, 1, 1

    key = jax.random.PRNGKey(0)
    ks = jax.random.split(key, 9)
    params = dict(
        dw_w=0.1 * jax.random.normal(ks[0], (Cin, 1, K, K), jnp.float32),
        dw_b=0.1 * jax.random.normal(ks[1], (Cin,), jnp.float32),
        bn_gamma=1.0 + 0.1 * jax.random.normal(ks[2], (Cin,), jnp.float32),
        bn_beta=0.1 * jax.random.normal(ks[3], (Cin,), jnp.float32),
        bn_mean=0.1 * jax.random.normal(ks[4], (Cin,), jnp.float32),
        bn_var=0.5 + jnp.abs(jax.random.normal(ks[5], (Cin,), jnp.float32)),
        pw_w=0.1 * jax.random.normal(ks[6], (Cout, Cin, 1, 1), jnp.float32),
        pw_b=0.1 * jax.random.normal(ks[7], (Cout,), jnp.float32),
    )
    x = jax.random.normal(ks[8], (N, Cin, H, W), jnp.float32)

    out = depthwise_conv_forward(x, params, kernel_size=K, padding=P, stride=S)
    out = jax.block_until_ready(out)

    ref = _reference_forward(x, params, kernel_size=K, padding=P, stride=S)
    assert out.shape == ref.shape == (N, Cout, H, W), (out.shape, ref.shape)
    assert jnp.allclose(out, ref, atol=1e-4, rtol=1e-4), float(
        jnp.max(jnp.abs(out - ref)))

    print("KERNEL_OK")
</pallas_src>

<mosaic_0001>
module attributes {stable_mosaic.version = 11 : i64} {
  func.func @_dwconv_bn_pw_kernel(%arg0: i32, %arg1: memref<8x342xf32, #tpu.memory_space<vmem>>, %arg2: memref<16x80xf32, #tpu.memory_space<vmem>>, %arg3: memref<16x288xf32, #tpu.memory_space<vmem>>, %arg4: memref<80x288xf32, #tpu.memory_space<vmem>>) attributes {dimension_semantics = [#tpu.dimension_semantics<parallel>], iteration_bounds = array<i64: 1>, scalar_prefetch = 0 : i64, scratch_operands = 1 : i64, tpu.core_type = #tpu.core_type<tc>, window_params = [{transform_indices = @transform_0, window_bounds = array<i64: 8, 342>}, {pipeline_mode = #tpu.pipeline_mode<synchronous>, transform_indices = @transform_1, window_bounds = array<i64: 16, 80>}, {transform_indices = @transform_2, window_bounds = array<i64: 16, 288>}]} {
    %c0_i32 = arith.constant 0 : i32
    %0 = arith.cmpi eq, %arg0, %c0_i32 : i32
    %1 = arith.extui %0 : i1 to i32
    %c0_i32_0 = arith.constant 0 : i32
    %2 = arith.cmpi ne, %1, %c0_i32_0 : i32
    scf.if %2 {
      %cst_18 = arith.constant 0.000000e+00 : f32
      %26 = vector.broadcast %cst_18 : f32 to vector<7x288xf32>
      %c73 = arith.constant 73 : index
      %c0_19 = arith.constant 0 : index
      %27 = vector.load %arg4[%c73, %c0_19] : memref<80x288xf32, #tpu.memory_space<vmem>>, vector<7x288xf32>
      tpu.vector_store %arg4[%c73, %c0_19], %26 {strides = array<i32>} : memref<80x288xf32, #tpu.memory_space<vmem>>, vector<7x288xf32>,
      %cst_20 = arith.constant 1.000000e+00 : f32
      %28 = vector.broadcast %cst_20 : f32 to vector<1x288xf32>
      %c72 = arith.constant 72 : index
      %c0_21 = arith.constant 0 : index
      %29 = vector.load %arg4[%c72, %c0_21] : memref<80x288xf32, #tpu.memory_space<vmem>>, vector<1x288xf32>
      tpu.vector_store %arg4[%c72, %c0_21], %28 {strides = array<i32>} : memref<80x288xf32, #tpu.memory_space<vmem>>, vector<1x288xf32>,
    } else {
    }
    %c0 = arith.constant 0 : index
    %c0_1 = arith.constant 0 : index
    %3 = vector.load %arg1[%c0, %c0_1] : memref<8x342xf32, #tpu.memory_space<vmem>>, vector<8x342xf32>
    %4 = vector.extract_strided_slice %3 {offsets = [0, 0], sizes = [8, 288], strides = [1, 1]} : vector<8x342xf32> to vector<8x288xf32>
    %c0_2 = arith.constant 0 : index
    %c0_3 = arith.constant 0 : index
    %5 = vector.load %arg4[%c0_2, %c0_3] : memref<80x288xf32, #tpu.memory_space<vmem>>, vector<8x288xf32>
    tpu.vector_store %arg4[%c0_2, %c0_3], %4 {strides = array<i32>} : memref<80x288xf32, #tpu.memory_space<vmem>>, vector<8x288xf32>,
    %6 = vector.extract_strided_slice %3 {offsets = [0, 1], sizes = [8, 288], strides = [1, 1]} : vector<8x342xf32> to vector<8x288xf32>
    %c8 = arith.constant 8 : index
    %c0_4 = arith.constant 0 : index
    %7 = vector.load %arg4[%c8, %c0_4] : memref<80x288xf32, #tpu.memory_space<vmem>>, vector<8x288xf32>
    tpu.vector_store %arg4[%c8, %c0_4], %6 {strides = array<i32>} : memref<80x288xf32, #tpu.memory_space<vmem>>, vector<8x288xf32>,
    %8 = vector.extract_strided_slice %3 {offsets = [0, 2], sizes = [8, 288], strides = [1, 1]} : vector<8x342xf32> to vector<8x288xf32>
    %c16 = arith.constant 16 : index
    %c0_5 = arith.constant 0 : index
    %9 = vector.load %arg4[%c16, %c0_5] : memref<80x288xf32, #tpu.memory_space<vmem>>, vector<8x288xf32>
    tpu.vector_store %arg4[%c16, %c0_5], %8 {strides = array<i32>} : memref<80x288xf32, #tpu.memory_space<vmem>>, vector<8x288xf32>,
    %10 = vector.extract_strided_slice %3 {offsets = [0, 18], sizes = [8, 288], strides = [1, 1]} : vector<8x342xf32> to vector<8x288xf32>
    %c24 = arith.constant 24 : index
    %c0_6 = arith.constant 0 : index
    %11 = vector.load %arg4[%c24, %c0_6] : memref<80x288xf32, #tpu.memory_space<vmem>>, vector<8x288xf32>
    tpu.vector_store %arg4[%c24, %c0_6], %10 {strides = array<i32>} : memref<80x288xf32, #tpu.memory_space<vmem>>, vector<8x288xf32>,
    %12 = vector.extract_strided_slice %3 {offsets = [0, 19], sizes = [8, 288], strides = [1, 1]} : vector<8x342xf32> to vector<8x288xf32>
    %c32 = arith.constant 32 : index
    %c0_7 = arith.constant 0 : index
    %13 = vector.load %arg4[%c32, %c0_7] : memref<80x288xf32, #tpu.memory_space<vmem>>, vector<8x288xf32>
    tpu.vector_store %arg4[%c32, %c0_7], %12 {strides = array<i32>} : memref<80x288xf32, #tpu.memory_space<vmem>>, vector<8x288xf32>,
    %14 = vector.extract_strided_slice %3 {offsets = [0, 20], sizes = [8, 288], strides = [1, 1]} : vector<8x342xf32> to vector<8x288xf32>
    %c40 = arith.constant 40 : index
    %c0_8 = arith.constant 0 : index
    %15 = vector.load %arg4[%c40, %c0_8] : memref<80x288xf32, #tpu.memory_space<vmem>>, vector<8x288xf32>
    tpu.vector_store %arg4[%c40, %c0_8], %14 {strides = array<i32>} : memref<80x288xf32, #tpu.memory_space<vmem>>, vector<8x288xf32>,
    %16 = vector.extract_strided_slice %3 {offsets = [0, 36], sizes = [8, 288], strides = [1, 1]} : vector<8x342xf32> to vector<8x288xf32>
    %c48 = arith.constant 48 : index
    %c0_9 = arith.constant 0 : index
    %17 = vector.load %arg4[%c48, %c0_9] : memref<80x288xf32, #tpu.memory_space<vmem>>, vector<8x288xf32>
    tpu.vector_store %arg4[%c48, %c0_9], %16 {strides = array<i32>} : memref<80x288xf32, #tpu.memory_space<vmem>>, vector<8x288xf32>,
    %18 = vector.extract_strided_slice %3 {offsets = [0, 37], sizes = [8, 288], strides = [1, 1]} : vector<8x342xf32> to vector<8x288xf32>
    %c56 = arith.constant 56 : index
    %c0_10 = arith.constant 0 : index
    %19 = vector.load %arg4[%c56, %c0_10] : memref<80x288xf32, #tpu.memory_space<vmem>>, vector<8x288xf32>
    tpu.vector_store %arg4[%c56, %c0_10], %18 {strides = array<i32>} : memref<80x288xf32, #tpu.memory_space<vmem>>, vector<8x288xf32>,
    %20 = vector.extract_strided_slice %3 {offsets = [0, 38], sizes = [8, 288], strides = [1, 1]} : vector<8x342xf32> to vector<8x288xf32>
    %c64 = arith.constant 64 : index
    %c0_11 = arith.constant 0 : index
    %21 = vector.load %arg4[%c64, %c0_11] : memref<80x288xf32, #tpu.memory_space<vmem>>, vector<8x288xf32>
    tpu.vector_store %arg4[%c64, %c0_11], %20 {strides = array<i32>} : memref<80x288xf32, #tpu.memory_space<vmem>>, vector<8x288xf32>,
    %c0_12 = arith.constant 0 : index
    %c0_13 = arith.constant 0 : index
    %22 = vector.load %arg2[%c0_12, %c0_13] : memref<16x80xf32, #tpu.memory_space<vmem>>, vector<16x80xf32>
    %c0_14 = arith.constant 0 : index
    %c0_15 = arith.constant 0 : index
    %23 = vector.load %arg4[%c0_14, %c0_15] : memref<80x288xf32, #tpu.memory_space<vmem>>, vector<80x288xf32>
    %cst = arith.constant dense<0.000000e+00> : vector<16x288xf32>
    %24 = tpu.matmul %22, %23, %cst {dimension_numbers = #tpu.dot_dimension_numbers<[1], [0], [0], [1], [0, 0, 1, 1], [], []>} : vector<16x80xf32>, vector<80x288xf32>, vector<16x288xf32> -> vector<16x288xf32>
    %c0_16 = arith.constant 0 : index
    %c0_17 = arith.constant 0 : index
    %25 = vector.load %arg3[%c0_16, %c0_17] : memref<16x288xf32, #tpu.memory_space<vmem>>, vector<16x288xf32>
    tpu.vector_store %arg3[%c0_16, %c0_17], %24 {strides = array<i32>} : memref<16x288xf32, #tpu.memory_space<vmem>>, vector<16x288xf32>,
    return
  }
  func.func @transform_0(%arg0: i32) -> (i32, i32) {
    %c0_i32 = arith.constant 0 : i32
    %c0_i32_0 = arith.constant 0 : i32
    return %arg0, %c0_i32 : i32, i32
  }
  func.func @transform_1(%arg0: i32) -> (i32, i32) {
    %c0_i32 = arith.constant 0 : i32
    %c0_i32_0 = arith.constant 0 : i32
    %c0_i32_1 = arith.constant 0 : i32
    return %c0_i32, %c0_i32_0 : i32, i32
  }
  func.func @transform_2(%arg0: i32) -> (i32, i32) {
    %c0_i32 = arith.constant 0 : i32
    %c0_i32_0 = arith.constant 0 : i32
    return %arg0, %c0_i32 : i32, i32
  }
}

</mosaic_0001>

<bundles_post_ra>
// kernel: tpu_custom_call.1
= control target key start
LH: loop header
LB: loop body
LE: loop exit
PB: predicated region body
PF: predicated region fallthrough
CT: control target
= control target key end

     0   :  { %7 = vsyncpa [#allocation4], 0  ;;  %s525_s0 = inlined_call_operand.hbm [shape: f32[8,342], index: 0, kind: input, shape index: {}]   ;;  %s526_s1 = inlined_call_operand.hbm [shape: f32[16,80], index: 1, kind: input, shape index: {}]   ;;  %s527_s2 = inlined_call_operand.hbm [shape: f32[16,288], index: 2, kind: output, shape index: {}]  }
   0x1   :  { %8 = vsyncpa [#allocation7], 0 }
   0x2   :  { %9 = vsyncpa [#allocation5], 0  ;;  %s15_s11 = sshll.u32 %s525_s0, 4  ;;  %s432_s12 = smov [#allocation3]   ;;  %s16_s11 = int_to_ptr.hbm [resolvable:$true] %s15_s11 }
   0x3   :  { %s17_s13 = sshll.u32 %s432_s12, 4  ;;  %s25_s16 = sshll.u32 %s526_s1, 4  ;;  %s18_s13 = int_to_ptr.vmem [resolvable:$true] %s17_s13  ;;  %s26_s16 = int_to_ptr.hbm [resolvable:$true] %s25_s16 }
   0x4   :  { %20 = dma.hbm_to_vmem [thread:$0]  %s16_s11, 384, %s18_s13, [#allocation4]  }
   0x5   :  { %s433_s17 = smov [#allocation6]   ;;  %s434_s19 = smov 128  }
   0x6   :  { %s27_s18 = sshll.u32 %s433_s17, 4  ;;  %s435_s20 = smov 8   ;;  %s28_s18 = int_to_ptr.vmem [resolvable:$true] %s27_s18 }
   0x7   :  { %33 = dma.hbm_to_vmem [thread:$0]  %s26_s16, 256, %s28_s18, [#allocation7], %s434_s19, %s434_s19, %s435_s20  }
   0x8   :  { %426 = dma.done.wait [#allocation4], 384  }
   0x9   :  { %427 = vsyncadd [#allocation4], 4294966912 }
   0xa   :  { %428 = dma.done.wait [#allocation7], 256  }
   0xb   :  { %429 = vsyncadd [#allocation7], 4294967040  ;;  %v59_v0 = vld [vmem:[#allocation3 + $0x10] sm:$0xff]  ;;  %v470_v1 = vld [vmem:[#allocation3 + $0x8] sm:$0xff]  ;;  %s436_s0 = smov 92   ;;  %s437_s21 = smov 90   ;;  %v50_v3 = vlaneseq }
   0xc   :  { %146 = vrot.lane.b32.xlu1 %v59_v0, %s436_s0  ;;  %176 = vrot.lane.b32.xlu0 %v59_v0, %s437_s21  ;;  %v472_v2 = vld [vmem:[#allocation3] sm:$0xff]  ;;  %s438_s1 = smov 108   ;;  %s439_s22 = smov 91   ;;  %vm62_vm0 = vcmask 261120   ;;  %vm48_vm1 = vcmask 261121   ;;  %v444_v4 = vmov 0.0  }
   0xd   :  { %131 = vrot.lane.b32.xlu2 %v59_v0, %s438_s1  ;;  %s440_s23 = smov 109   ;;  %s441_s24 = smov 110   ;;  %63 = vst.msk [vmem:[#allocation2 + $0x10] sm:$0xff] %vm62_vm0, %v59_v0  ;;  %vm52_vm2 = vcmp.lt.s32.totalorder %v50_v3, 288  ;;  %v445_v5 = vmov 1.0   ;;  %vm148_vm3 = vcmask 752640  }
   0xe   :  { %s442_s25 = smov 126   ;;  %s443_s26 = smov 127   ;;  %49 = vst.msk [vmem:[#allocation2 + $0xe8] sm:$0xfe] %vm48_vm1, %v444_v4  ;;  %vm133_vm4 = vcmask 883712   ;;  %vm163_vm5 = vcmask 744448  }
   0xf   :  { %55 = vst.msk [vmem:[#allocation2 + $0xd8] ss:$8 sm:$0x7] %vm52_vm2, %v445_v5  ;;  %vm178_vm6 = vcmask 736256   ;;  %vm118_vm7 = vcmask 891904   ;;  %vm103_vm8 = vcmask 900096  }
  0x10   :  { %46 = vst [vmem:[#allocation2 + $0xd8] sm:$0xfe] %v444_v4  ;;  %vm88_vm9 = vcmask 1031168   ;;  %v187_v52 = vld [vmem:[#allocation6] sm:$0xff]  ;;  %vm219_vm10 = vcmask 654336   ;;  %vm73_vm11 = vcmask 1039360  }
  0x11   :  { %47 = vst [vmem:[#allocation2 + $0xe0] sm:$0xfe] %v444_v4  ;;  %v188_v59 = vld [vmem:[#allocation6 + $0x8] sm:$0xff]  ;;  %s446_s27 = smov [#allocation8]   ;;  %s307_s3 = sshll.u32 %s527_s2, 4  ;;  %s308_s3 = int_to_ptr.hbm [resolvable:$true] %s307_s3 }
  0x12   :  { %s305_s28 = sshll.u32 %s446_s27, 4  ;;  %s447_s4 = smov 384   ;;  %s306_s28 = int_to_ptr.vmem [resolvable:$true] %s305_s28 }
  0x13   :  { %s448_s5 = smov 24  }
  0x14   :  { %161 = vrot.lane.b32.xlu0 %v59_v0, %s439_s22  ;;  %174 = vrot.lane.b32.xlu1 %v470_v1, %s437_s21  ;;  %v191_v49 = vld [vmem:[#allocation2 + $0x10] sm:$0xff] }
  0x15   :  { %159 = vrot.lane.b32.xlu2 %v470_v1, %s439_s22 }
  0x16   :  { %v218_v7 = vld [vmem:[#allocation2 + $0xe8] sm:$0xff] }
  0x17   :  { %278 = vmatpush.msra.mxu2 %v218_v7  ;;  %v216_v10 = vld [vmem:[#allocation2 + $0xd8] sm:$0xff] }
  0x18   :  { %v217_v8 = vld [vmem:[#allocation2 + $0xe0] sm:$0xff]  ;;  %232 = vmatpush.msra.mxu0 %v216_v10  ;;  %327 = vmatpush.msra.mxu3 %v216_v10 }
  0x19   :  { %255 = vmatpush.msra.mxu1 %v217_v8 }
  0x1c   :  { %116 = vrot.lane.b32.xlu1 %v59_v0, %s440_s23  ;;  %172 = vrot.lane.b32.xlu0 %v472_v2, %s437_s21 }
  0x1d   :  { %144 = vrot.lane.b32.xlu2 %v470_v1, %s436_s0 }
  0x24   :  { %101 = vrot.lane.b32.xlu1 %v59_v0, %s441_s24  ;;  %157 = vrot.lane.b32.xlu0 %v472_v2, %s439_s22 }
  0x25   :  { %129 = vrot.lane.b32.xlu2 %v470_v1, %s438_s1 }
  0x2c   :  { %86 = vrot.lane.b32.xlu1 %v59_v0, %s442_s25  ;;  %142 = vrot.lane.b32.xlu0 %v472_v2, %s436_s0 }
  0x2d   :  { %114 = vrot.lane.b32.xlu2 %v470_v1, %s440_s23 }
  0x34   :  { %71 = vrot.lane.b32.xlu1 %v59_v0, %s443_s26  ;;  %127 = vrot.lane.b32.xlu0 %v472_v2, %s438_s1 }
  0x35   :  { %99 = vrot.lane.b32.xlu2 %v470_v1, %s441_s24 }
  0x3c   :  { %84 = vrot.lane.b32.xlu1 %v470_v1, %s442_s25  ;;  %112 = vrot.lane.b32.xlu0 %v472_v2, %s440_s23 }
  0x3d   :  { %97 = vrot.lane.b32.xlu2 %v472_v2, %s441_s24 }
  0x44   :  { %82 = vrot.lane.b32.xlu1 %v472_v2, %s442_s25  ;;  %69 = vrot.lane.b32.xlu0 %v470_v1, %s443_s26 }
  0x45   :  { %67 = vrot.lane.b32.xlu2 %v472_v2, %s443_s26 }
  0x67   :  { %v132_v6 = vpop.permute.xlu2 %131 }
  0x68   :  { %141 = vst.msk [vmem:[#allocation2 + $0x88] sm:$0xff] %vm62_vm0, %v132_v6 }
  0x6f   :  { %v160_v9 = vpop.permute.xlu2 %159  ;;  %v206_v30 = vld [vmem:[#allocation2 + $0x88] sm:$0xff] }
  0x77   :  { %v145_v11 = vpop.permute.xlu2 %144 }
  0x7e   :  { %v147_v12 = vpop.permute.xlu1 %146  ;;  %v177_v13 = vpop.permute.xlu0 %176 }
  0x7f   :  { %v150_v14 = vsel %vm148_vm3, %v145_v11, %v147_v12  ;;  %156 = vst.msk [vmem:[#allocation2 + $0xa0] sm:$0xff] %vm62_vm0, %v147_v12  ;;  %v130_v15 = vpop.permute.xlu2 %129 }
  0x80   :  { %v135_v16 = vsel %vm133_vm4, %v130_v15, %v132_v6  ;;  %186 = vst.msk [vmem:[#allocation2 + $0xd0] sm:$0xff] %vm62_vm0, %v177_v13 }
  0x86   :  { %v162_v17 = vpop.permute.xlu0 %161  ;;  %v175_v18 = vpop.permute.xlu1 %174  ;;  %v209_v29 = vld [vmem:[#allocation2 + $0xa0] sm:$0xff] }
  0x87   :  { %v165_v19 = vsel %vm163_vm5, %v160_v9, %v162_v17  ;;  %171 = vst.msk [vmem:[#allocation2 + $0xb8] sm:$0xff] %vm62_vm0, %v162_v17  ;;  %v180_v20 = vsel %vm178_vm6, %v175_v18, %v177_v13  ;;  %v115_v21 = vpop.permute.xlu2 %114  ;;  %v215_v22 = vld [vmem:[#allocation2 + $0xd0] sm:$0xff] }
  0x88   :  { %256 = vmatpush.msra.mxu1 %v180_v20  ;;  %279 = vmatpush.msra.mxu2 %v215_v22 }
  0x8a   :  { %257 = vmatpush.msra.mxu1 %v165_v19 }
  0x8c   :  { %258 = vmatpush.msra.mxu1 %v150_v14 }
  0x8e   :  { %v117_v23 = vpop.permute.xlu1 %116  ;;  %v173_v24 = vpop.permute.xlu0 %172  ;;  %v212_v25 = vld [vmem:[#allocation2 + $0xb8] sm:$0xff]  ;;  %259 = vmatpush.msra.mxu1 %v135_v16 }
  0x8f   :  { %v120_v26 = vsel %vm118_vm7, %v115_v21, %v117_v23  ;;  %126 = vst.msk [vmem:[#allocation2 + $0x70] sm:$0xff] %vm62_vm0, %v117_v23  ;;  %v179_v27 = vsel %vm178_vm6, %v173_v24, %v175_v18  ;;  %280 = vmatpush.msra.mxu2 %v212_v25  ;;  %v100_v28 = vpop.permute.xlu2 %99 }
  0x90   :  { %233 = vmatpush.msra.mxu0 %v179_v27  ;;  %328 = vmatpush.msra.mxu3 %v179_v27 }
  0x91   :  { %281 = vmatpush.msra.mxu2 %v209_v29  ;;  %260 = vmatpush.msra.mxu1 %v120_v26 }
  0x93   :  { %282 = vmatpush.msra.mxu2 %v206_v30 }
  0x96   :  { %v102_v31 = vpop.permute.xlu1 %101  ;;  %v158_v32 = vpop.permute.xlu0 %157  ;;  %v203_v33 = vld [vmem:[#allocation2 + $0x70] sm:$0xff] }
  0x97   :  { %v105_v34 = vsel %vm103_vm8, %v100_v28, %v102_v31  ;;  %111 = vst.msk [vmem:[#allocation2 + $0x58] sm:$0xff] %vm62_vm0, %v102_v31  ;;  %v164_v35 = vsel %vm163_vm5, %v158_v32, %v160_v9  ;;  %283 = vmatpush.msra.mxu2 %v203_v33  ;;  %v98_v36 = vpop.permute.xlu2 %97 }
  0x98   :  { %234 = vmatpush.msra.mxu0 %v164_v35  ;;  %329 = vmatpush.msra.mxu3 %v164_v35  ;;  %v104_v37 = vsel %vm103_vm8, %v98_v36, %v100_v28 }
  0x99   :  { %261 = vmatpush.msra.mxu1 %v105_v34 }
  0x9e   :  { %v87_v38 = vpop.permute.xlu1 %86  ;;  %v143_v39 = vpop.permute.xlu0 %142  ;;  %v200_v40 = vld [vmem:[#allocation2 + $0x58] sm:$0xff] }
  0x9f   :  { %96 = vst.msk [vmem:[#allocation2 + $0x40] sm:$0xff] %vm62_vm0, %v87_v38  ;;  %v149_v41 = vsel %vm148_vm3, %v143_v39, %v145_v11  ;;  %284 = vmatpush.msra.mxu2 %v200_v40  ;;  %v68_v53 = vpop.permute.xlu2 %67 }
  0xa0   :  { %235 = vmatpush.msra.mxu0 %v149_v41  ;;  %330 = vmatpush.msra.mxu3 %v149_v41 }
  0xa6   :  { %v72_v42 = vpop.permute.xlu1 %71  ;;  %v128_v43 = vpop.permute.xlu0 %127  ;;  %v197_v44 = vld [vmem:[#allocation2 + $0x40] sm:$0xff] }
  0xa7   :  { %81 = vst.msk [vmem:[#allocation2 + $0x28] sm:$0xff] %vm62_vm0, %v72_v42  ;;  %v134_v45 = vsel %vm133_vm4, %v128_v43, %v130_v15  ;;  %285 = vmatpush.msra.mxu2 %v197_v44 }
  0xa8   :  { %236 = vmatpush.msra.mxu0 %v134_v45  ;;  %331 = vmatpush.msra.mxu3 %v134_v45 }
  0xae   :  { %v85_v46 = vpop.permute.xlu1 %84  ;;  %v113_v47 = vpop.permute.xlu0 %112  ;;  %v194_v48 = vld [vmem:[#allocation2 + $0x28] sm:$0xff] }
  0xaf   :  { %v90_v50 = vsel %vm88_vm9, %v85_v46, %v87_v38  ;;  %v119_v51 = vsel %vm118_vm7, %v113_v47, %v115_v21  ;;  %286 = vmatpush.msra.mxu2 %v194_v48 }
  0xb0   :  { %237 = vmatpush.msra.mxu0 %v119_v51  ;;  %332 = vmatpush.msra.mxu3 %v119_v51 }
  0xb1   :  { %262 = vmatpush.msra.mxu1 %v90_v50  ;;  %287 = vmatpush.msra.mxu2 %v191_v49 }
  0xb2   :  { %238 = vmatpush.msra.mxu0 %v104_v37  ;;  %333 = vmatpush.msra.mxu3 %v104_v37 }
  0xb3   :  { %325 = vmatmul.msk.f32.vlgmr.msra.gmra.mxu2 %vm219_vm10, %v187_v52 }
  0xb6   :  { %v83_v54 = vpop.permute.xlu1 %82  ;;  %v70_v55 = vpop.permute.xlu0 %69 }
  0xb7   :  { %v89_v56 = vsel %vm88_vm9, %v83_v54, %v85_v46  ;;  %v74_v57 = vsel %vm73_vm11, %v68_v53, %v70_v55  ;;  %v75_v58 = vsel %vm73_vm11, %v70_v55, %v72_v42 }
  0xb8   :  { %239 = vmatpush.msra.mxu0 %v89_v56  ;;  %334 = vmatpush.msra.mxu3 %v89_v56 }
  0xb9   :  { %263 = vmatpush.msra.mxu1 %v75_v58 }
  0xba   :  { %240 = vmatpush.msra.mxu0 %v74_v57  ;;  %335 = vmatpush.msra.mxu3 %v74_v57 }
  0xbb   :  { %264 = vmatpush.msra.mxu1 %v470_v1  ;;  %326 = vmatmul.msk.f32.gmra.mxu2 %vm219_vm10, %v188_v59 }
  0xbc   :  { %323 = vmatmul.msk.f32.vlgmr.msra.gmra.mxu1 %vm219_vm10, %v187_v52  ;;  %336 = vmatpush.msra.mxu3 %v472_v2 }
  0xbd   :  { %322 = vmatmul.msk.f32.vlgmr.msra.gmra.mxu3 %vm219_vm10, %v188_v59  ;;  %241 = vmatpush.msra.mxu0 %v472_v2 }
  0xbe   :  { %321 = vmatmul.msk.f32.vlgmr.msra.gmra.mxu0 %vm219_vm10, %v187_v52 }
  0xc4   :  { %324 = vmatmul.msk.f32.gmra.mxu1 %vm219_vm10, %v188_v59 }
 0x136   :  { %v289_v60 = vpop.f32.mrf.mxu2 }
 0x137   :  { %297 = vst.msk [vmem:[#allocation8 + $0x10] sm:$0xff] %vm62_vm0, %v289_v60 }
 0x139   :  { %v266_v61 = vpop.f32.mrf.mxu1 }
 0x13a   :  { %296 = vst [vmem:[#allocation8 + $0x8] sm:$0xff] %v266_v61 }
 0x13b   :  { %v243_v62 = vpop.f32.mrf.mxu0 }
 0x13c   :  { %295 = vst [vmem:[#allocation8] sm:$0xff] %v243_v62 }
 0x13e   :  { %v292_v63 = vpop.f32.mrf.mxu2 }
 0x13f   :  { %300 = vst.msk [vmem:[#allocation8 + $0x28] sm:$0xff] %vm62_vm0, %v292_v63 }
 0x140   :  { %v246_v0 = vpop.f32.mrf.mxu3 }
 0x141   :  { %298 = vst [vmem:[#allocation8 + $0x18] sm:$0xff] %v246_v0  ;;  %v269_v1 = vpop.f32.mrf.mxu1 }
 0x142   :  { %299 = vst [vmem:[#allocation8 + $0x20] sm:$0xff] %v269_v1 }
 0x143   :  { %313 = dma.vmem_to_hbm [thread:$0]  %s306_s28, 768, %s308_s3, [#allocation5], %s447_s4, %s447_s4, %s448_s5  }
 0x144   :  { %430 = dma.done.wait [#allocation5], 768  }
 0x145   :  { %431 = vsyncadd [#allocation5], 4294966528 }
 0x146   :  { %318 = vsyncpa [#allocation4], 1 }
 0x147   :  { %319 = vsyncpa [#allocation7], 1 }
 0x148   :  { %320 = vsyncpa [#allocation5], 1 }

</bundles_post_ra>
